<compile_context>
chip_gen: v7x
topology: tpu7x:2x2x1
jax: 0.10.0
libtpu: 0.0.40
codegen_flags: <defaults>
</compile_context>

<pallas_src>
import functools

import jax
import jax.numpy as jnp
from jax import lax
from jax.experimental import pallas as pl
from jax.experimental.pallas import tpu as pltpu


def lead_cnn_kernel(xwin_ref, w1_ref, b1_ref, w2_ref, b2_ref, wl_ref, bl_ref,
                    out_ref, acc_ref, *, T2, L1, L2):
    """One (batch row, time tile) step.

    xwin_ref : (4, T2+4)  four stride-4 phases of padded x; phase r, padded
               index p holds x[4*(t0 + p - 2) + r] (zero outside [0, L)).
    h1 is produced split into even/odd conv1 outputs so conv2's stride-2
    access becomes plain shifted slices of the same tile.
    """
    t_idx = pl.program_id(1)
    SE = T2 + 2                      # extended h1 window: s in [t0-1, t0+T2]

    slab = xwin_ref[...]             # (4, T2+4)
    w1 = w1_ref[...]                 # (16, 7)
    b1 = b1_ref[...]                 # (16, 1)
    w1_cols = [w1[:, k:k + 1] for k in range(7)]   # hoisted (16,1) tap weights

    def conv1(taps):
        # taps[k] = (phase r, lane offset) such that slab[r, off+u] is the
        # input sample for conv1 tap k at extended position u.
        pre = b1
        for k, (r, off) in enumerate(taps):
            pre = pre + w1_cols[k] * slab[r:r + 1, off:off + SE]
        return jnp.maximum(pre, 0.0)                 # (16, SE)

    # h1[2s]   uses x[4s + k - 3];  h1[2s+1] uses x[4s + k - 1]  (k = 0..6)
    h1e = conv1([(1, 0), (2, 0), (3, 0), (0, 1), (1, 1), (2, 1), (3, 1)])
    h1o = conv1([(3, 0), (0, 1), (1, 1), (2, 1), (3, 1), (0, 2), (1, 2)])

    # Zero the positions that correspond to conv2's zero padding / past L1.
    s_idx = t_idx * T2 - 1 + lax.broadcasted_iota(jnp.int32, (1, SE), 1)
    h1e = jnp.where((s_idx >= 0) & (2 * s_idx < L1), h1e, 0.0)
    h1o = jnp.where((s_idx >= 0) & (2 * s_idx + 1 < L1), h1o, 0.0)

    # conv2 fused into ONE K=80 matmul: stack the 5 taps on the channel axis.
    h1s = jnp.concatenate(
        [h1e[:, 0:T2],          # h1[2t-2]
         h1o[:, 0:T2],          # h1[2t-1]
         h1e[:, 1:T2 + 1],      # h1[2t]
         h1o[:, 1:T2 + 1],      # h1[2t+1]
         h1e[:, 2:T2 + 2]],     # h1[2t+2]
        axis=0)                                       # (80, T2)
    h2 = jnp.maximum(
        lax.dot_general(w2_ref[...], h1s, (((1,), (0,)), ((), ())),
                        preferred_element_type=jnp.float32) + b2_ref[...],
        0.0)                                          # (32, T2)

    # Masked partial sum for the mean pool (1/L2 is folded into wl).
    t_glob = t_idx * T2 + lax.broadcasted_iota(jnp.int32, (1, T2), 1)
    part = jnp.sum(jnp.where(t_glob < L2, h2, 0.0), axis=1, keepdims=True)

    @pl.when(t_idx == 0)
    def _():
        acc_ref[...] = jnp.zeros_like(acc_ref)

    acc_ref[...] += part                              # (32, 1)

    @pl.when(t_idx == pl.num_programs(1) - 1)
    def _():
        pooled = acc_ref[...]                                     # (32, 1)
        out = jnp.sum(pooled * wl_ref[...], axis=0, keepdims=True) + bl_ref[...]
        out_ref[...] = out                                        # (1, D)


def lead_cnn_forward(lead_signals, params, *, time_tile=512):
    w1, b1 = params["w1"], params["b1"]      # (16,1,7), (16,)
    w2, b2 = params["w2"], params["b2"]      # (32,16,5), (32,)
    wl, bl = params["wl"], params["bl"]      # (D,32),  (D,)

    x = lead_signals.astype(jnp.float32)
    B, L = x.shape
    L1 = (L + 2 * 3 - 7) // 2 + 1            # conv1 output length
    L2 = (L1 + 2 * 2 - 5) // 2 + 1           # conv2 output length
    D = wl.shape[0]

    T2 = time_tile if L2 > time_tile else L2
    n_t2 = pl.cdiv(L2, T2)
    SEW = T2 + 4                             # per-tile x window (phase domain)
    J = n_t2 * T2 + 2

    # --- wrapper glue: 4-phase split of x + per-tile halo windows (~1x bytes).
    x_pad = jnp.pad(x, ((0, 0), (0, 4 * J - L)))
    xph = x_pad.reshape(B, J, 4).transpose(0, 2, 1)        # xph[b,r,j] = x[4j+r]
    xph = jnp.pad(xph, ((0, 0), (0, 0), (2, 0)))           # left halo of 2
    win = jnp.arange(n_t2)[:, None] * T2 + jnp.arange(SEW)[None, :]
    xwin = jnp.transpose(xph[:, :, win], (0, 2, 1, 3))     # (B, n_t2, 4, SEW)

    # --- weight re-layouts (all MACs happen inside the kernel).
    w1m = w1[:, 0, :]                                      # (16, 7)
    b1c = b1.reshape(16, 1)
    w2m = jnp.transpose(w2, (0, 2, 1)).reshape(32, 80)     # [co, 16*k + ci]
    b2c = b2.reshape(32, 1)
    wlm = jnp.transpose(wl) / float(L2)                    # mean folded in
    blr = bl.reshape(1, D)

    kernel = functools.partial(lead_cnn_kernel, T2=T2, L1=L1, L2=L2)
    flops = B * (L1 * 2 * 7 * 16 + L2 * 2 * 80 * 32 + 2 * 32 * D)
    bytes_accessed = 4 * (B * n_t2 * 4 * SEW + B * D
                          + 16 * 7 + 16 + 32 * 80 + 32 + 32 * D + D)

    out = pl.pallas_call(
        kernel,
        out_shape=jax.ShapeDtypeStruct((B, 1, D), jnp.float32),
        grid_spec=pltpu.PrefetchScalarGridSpec(
            num_scalar_prefetch=0,
            grid=(B, n_t2),
            in_specs=[
                pl.BlockSpec((None, None, 4, SEW), lambda b, t: (b, t, 0, 0)),
                pl.BlockSpec((16, 7), lambda b, t: (0, 0)),
                pl.BlockSpec((16, 1), lambda b, t: (0, 0)),
                pl.BlockSpec((32, 80), lambda b, t: (0, 0)),
                pl.BlockSpec((32, 1), lambda b, t: (0, 0)),
                pl.BlockSpec((32, D), lambda b, t: (0, 0)),
                pl.BlockSpec((1, D), lambda b, t: (0, 0)),
            ],
            out_specs=pl.BlockSpec((None, 1, D), lambda b, t: (b, 0, 0)),
            scratch_shapes=[pltpu.VMEM((32, 1), jnp.float32)],
        ),
        compiler_params=pltpu.CompilerParams(
            dimension_semantics=("parallel", "arbitrary"),
            vmem_limit_bytes=32 * 1024 * 1024),
        cost_estimate=pl.CostEstimate(flops=flops, transcendentals=0,
                                      bytes_accessed=bytes_accessed),
    )(xwin, w1m, b1c, w2m, b2c, wlm, blr)
    return out.reshape(B, D)


def ref_forward(x, params):
    """Pure-JAX reference matching the PyTorch module (cross-correlation)."""
    w1, b1 = params["w1"], params["b1"]
    w2, b2 = params["w2"], params["b2"]
    wl, bl = params["wl"], params["bl"]
    y = x[:, None, :]                                             # (B,1,L) NCW
    y = lax.conv_general_dilated(y, w1, (2,), [(3, 3)],
                                 dimension_numbers=("NCH", "OIH", "NCH"))
    y = jax.nn.relu(y + b1[None, :, None])
    y = lax.conv_general_dilated(y, w2, (2,), [(2, 2)],
                                 dimension_numbers=("NCH", "OIH", "NCH"))
    y = jax.nn.relu(y + b2[None, :, None])
    y = jnp.mean(y, axis=-1)                                      # pool to 1
    return y @ wl.T + bl


def init_params(key, output_dim):
    ks = jax.random.split(key, 6)
    scale = 0.1
    return {
        "w1": scale * jax.random.normal(ks[0], (16, 1, 7), jnp.float32),
        "b1": scale * jax.random.normal(ks[1], (16,), jnp.float32),
        "w2": scale * jax.random.normal(ks[2], (32, 16, 5), jnp.float32),
        "b2": scale * jax.random.normal(ks[3], (32,), jnp.float32),
        "wl": scale * jax.random.normal(ks[4], (output_dim, 32), jnp.float32),
        "bl": scale * jax.random.normal(ks[5], (output_dim,), jnp.float32),
    }


if __name__ == "__main__":
    key = jax.random.PRNGKey(0)
    k_param, k_data, k_param2, k_data2 = jax.random.split(key, 4)

    # Test 1: small canonical shapes (single time tile).
    B, L, output_dim = 2, 16, 8
    params = init_params(k_param, output_dim)
    lead_signals = jax.random.normal(k_data, (B, L), jnp.float32)
    out = jax.block_until_ready(lead_cnn_forward(lead_signals, params))
    ref = jax.block_until_ready(ref_forward(lead_signals, params))
    err = float(jnp.max(jnp.abs(out - ref)))
    assert out.shape == (B, output_dim)
    assert err < 1e-4, f"mismatch vs reference (test 1): {err}"

    # Test 2: odd conv1 length + multi-tile time grid with masked tail.
    B2, L2_sig, output_dim2 = 3, 50, 5
    params2 = init_params(k_param2, output_dim2)
    lead_signals2 = jax.random.normal(k_data2, (B2, L2_sig), jnp.float32)
    out2 = jax.block_until_ready(
        lead_cnn_forward(lead_signals2, params2, time_tile=4))
    ref2 = jax.block_until_ready(ref_forward(lead_signals2, params2))
    err2 = float(jnp.max(jnp.abs(out2 - ref2)))
    assert out2.shape == (B2, output_dim2)
    assert err2 < 1e-4, f"mismatch vs reference (test 2): {err2}"

    print("KERNEL_OK")
</pallas_src>

<mosaic_0001>
module attributes {stable_mosaic.version = 11 : i64} {
  func.func @lead_cnn_kernel(%arg0: i32, %arg1: i32, %arg2: memref<1x1x4x8xf32, #tpu.memory_space<vmem>>, %arg3: memref<16x7xf32, #tpu.memory_space<vmem>>, %arg4: memref<16x1xf32, #tpu.memory_space<vmem>>, %arg5: memref<32x80xf32, #tpu.memory_space<vmem>>, %arg6: memref<32x1xf32, #tpu.memory_space<vmem>>, %arg7: memref<32x8xf32, #tpu.memory_space<vmem>>, %arg8: memref<1x8xf32, #tpu.memory_space<vmem>>, %arg9: memref<1x1x8xf32, #tpu.memory_space<vmem>>, %arg10: memref<32x1xf32, #tpu.memory_space<vmem>>) attributes {dimension_semantics = [#tpu.dimension_semantics<parallel>, #tpu.dimension_semantics<arbitrary>], iteration_bounds = array<i64: 2, 1>, scalar_prefetch = 0 : i64, scratch_operands = 1 : i64, tpu.core_type = #tpu.core_type<tc>, window_params = [{transform_indices = @transform_0, window_bounds = array<i64: 1, 1, 4, 8>}, {pipeline_mode = #tpu.pipeline_mode<synchronous>, transform_indices = @transform_1, window_bounds = array<i64: 16, 7>}, {pipeline_mode = #tpu.pipeline_mode<synchronous>, transform_indices = @transform_2, window_bounds = array<i64: 16, 1>}, {pipeline_mode = #tpu.pipeline_mode<synchronous>, transform_indices = @transform_3, window_bounds = array<i64: 32, 80>}, {pipeline_mode = #tpu.pipeline_mode<synchronous>, transform_indices = @transform_4, window_bounds = array<i64: 32, 1>}, {pipeline_mode = #tpu.pipeline_mode<synchronous>, transform_indices = @transform_5, window_bounds = array<i64: 32, 8>}, {pipeline_mode = #tpu.pipeline_mode<synchronous>, transform_indices = @transform_6, window_bounds = array<i64: 1, 8>}, {transform_indices = @transform_7, window_bounds = array<i64: 1, 1, 8>}]} {
    %c0 = arith.constant 0 : index
    %c0_0 = arith.constant 0 : index
    %c0_1 = arith.constant 0 : index
    %c0_2 = arith.constant 0 : index
    %0 = vector.load %arg2[%c0, %c0_0, %c0_1, %c0_2] : memref<1x1x4x8xf32, #tpu.memory_space<vmem>>, vector<1x1x4x8xf32>
    %1 = vector.shape_cast %0 : vector<1x1x4x8xf32> to vector<4x8xf32>
    %c0_3 = arith.constant 0 : index
    %c0_4 = arith.constant 0 : index
    %2 = vector.load %arg3[%c0_3, %c0_4] : memref<16x7xf32, #tpu.memory_space<vmem>>, vector<16x7xf32>
    %c0_5 = arith.constant 0 : index
    %c0_6 = arith.constant 0 : index
    %3 = vector.load %arg4[%c0_5, %c0_6] : memref<16x1xf32, #tpu.memory_space<vmem>>, vector<16x1xf32>
    %4 = vector.extract_strided_slice %2 {offsets = [0, 0], sizes = [16, 1], strides = [1, 1]} : vector<16x7xf32> to vector<16x1xf32>
    %5 = vector.extract_strided_slice %2 {offsets = [0, 1], sizes = [16, 1], strides = [1, 1]} : vector<16x7xf32> to vector<16x1xf32>
    %6 = vector.extract_strided_slice %2 {offsets = [0, 2], sizes = [16, 1], strides = [1, 1]} : vector<16x7xf32> to vector<16x1xf32>
    %7 = vector.extract_strided_slice %2 {offsets = [0, 3], sizes = [16, 1], strides = [1, 1]} : vector<16x7xf32> to vector<16x1xf32>
    %8 = vector.extract_strided_slice %2 {offsets = [0, 4], sizes = [16, 1], strides = [1, 1]} : vector<16x7xf32> to vector<16x1xf32>
    %9 = vector.extract_strided_slice %2 {offsets = [0, 5], sizes = [16, 1], strides = [1, 1]} : vector<16x7xf32> to vector<16x1xf32>
    %10 = vector.extract_strided_slice %2 {offsets = [0, 6], sizes = [16, 1], strides = [1, 1]} : vector<16x7xf32> to vector<16x1xf32>
    %11 = vector.extract_strided_slice %1 {offsets = [1, 0], sizes = [1, 6], strides = [1, 1]} : vector<4x8xf32> to vector<1x6xf32>
    %12 = vector.broadcast %4 : vector<16x1xf32> to vector<16x6xf32>
    %13 = vector.broadcast %11 : vector<1x6xf32> to vector<16x6xf32>
    %14 = arith.mulf %12, %13 : vector<16x6xf32>
    %15 = vector.broadcast %3 : vector<16x1xf32> to vector<16x6xf32>
    %16 = arith.addf %15, %14 : vector<16x6xf32>
    %17 = vector.extract_strided_slice %1 {offsets = [2, 0], sizes = [1, 6], strides = [1, 1]} : vector<4x8xf32> to vector<1x6xf32>
    %18 = vector.broadcast %5 : vector<16x1xf32> to vector<16x6xf32>
    %19 = vector.broadcast %17 : vector<1x6xf32> to vector<16x6xf32>
    %20 = arith.mulf %18, %19 : vector<16x6xf32>
    %21 = arith.addf %16, %20 : vector<16x6xf32>
    %22 = vector.extract_strided_slice %1 {offsets = [3, 0], sizes = [1, 6], strides = [1, 1]} : vector<4x8xf32> to vector<1x6xf32>
    %23 = vector.broadcast %6 : vector<16x1xf32> to vector<16x6xf32>
    %24 = vector.broadcast %22 : vector<1x6xf32> to vector<16x6xf32>
    %25 = arith.mulf %23, %24 : vector<16x6xf32>
    %26 = arith.addf %21, %25 : vector<16x6xf32>
    %27 = vector.extract_strided_slice %1 {offsets = [0, 1], sizes = [1, 6], strides = [1, 1]} : vector<4x8xf32> to vector<1x6xf32>
    %28 = vector.broadcast %7 : vector<16x1xf32> to vector<16x6xf32>
    %29 = vector.broadcast %27 : vector<1x6xf32> to vector<16x6xf32>
    %30 = arith.mulf %28, %29 : vector<16x6xf32>
    %31 = arith.addf %26, %30 : vector<16x6xf32>
    %32 = vector.extract_strided_slice %1 {offsets = [1, 1], sizes = [1, 6], strides = [1, 1]} : vector<4x8xf32> to vector<1x6xf32>
    %33 = vector.broadcast %8 : vector<16x1xf32> to vector<16x6xf32>
    %34 = vector.broadcast %32 : vector<1x6xf32> to vector<16x6xf32>
    %35 = arith.mulf %33, %34 : vector<16x6xf32>
    %36 = arith.addf %31, %35 : vector<16x6xf32>
    %37 = vector.extract_strided_slice %1 {offsets = [2, 1], sizes = [1, 6], strides = [1, 1]} : vector<4x8xf32> to vector<1x6xf32>
    %38 = vector.broadcast %9 : vector<16x1xf32> to vector<16x6xf32>
    %39 = vector.broadcast %37 : vector<1x6xf32> to vector<16x6xf32>
    %40 = arith.mulf %38, %39 : vector<16x6xf32>
    %41 = arith.addf %36, %40 : vector<16x6xf32>
    %42 = vector.extract_strided_slice %1 {offsets = [3, 1], sizes = [1, 6], strides = [1, 1]} : vector<4x8xf32> to vector<1x6xf32>
    %43 = vector.broadcast %10 : vector<16x1xf32> to vector<16x6xf32>
    %44 = vector.broadcast %42 : vector<1x6xf32> to vector<16x6xf32>
    %45 = arith.mulf %43, %44 : vector<16x6xf32>
    %46 = arith.addf %41, %45 : vector<16x6xf32>
    %cst = arith.constant 0.000000e+00 : f32
    %47 = vector.broadcast %cst : f32 to vector<16x6xf32>
    %48 = arith.maximumf %46, %47 : vector<16x6xf32>
    %49 = vector.extract_strided_slice %1 {offsets = [3, 0], sizes = [1, 6], strides = [1, 1]} : vector<4x8xf32> to vector<1x6xf32>
    %50 = vector.broadcast %4 : vector<16x1xf32> to vector<16x6xf32>
    %51 = vector.broadcast %49 : vector<1x6xf32> to vector<16x6xf32>
    %52 = arith.mulf %50, %51 : vector<16x6xf32>
    %53 = vector.broadcast %3 : vector<16x1xf32> to vector<16x6xf32>
    %54 = arith.addf %53, %52 : vector<16x6xf32>
    %55 = vector.extract_strided_slice %1 {offsets = [0, 1], sizes = [1, 6], strides = [1, 1]} : vector<4x8xf32> to vector<1x6xf32>
    %56 = vector.broadcast %5 : vector<16x1xf32> to vector<16x6xf32>
    %57 = vector.broadcast %55 : vector<1x6xf32> to vector<16x6xf32>
    %58 = arith.mulf %56, %57 : vector<16x6xf32>
    %59 = arith.addf %54, %58 : vector<16x6xf32>
    %60 = vector.extract_strided_slice %1 {offsets = [1, 1], sizes = [1, 6], strides = [1, 1]} : vector<4x8xf32> to vector<1x6xf32>
    %61 = vector.broadcast %6 : vector<16x1xf32> to vector<16x6xf32>
    %62 = vector.broadcast %60 : vector<1x6xf32> to vector<16x6xf32>
    %63 = arith.mulf %61, %62 : vector<16x6xf32>
    %64 = arith.addf %59, %63 : vector<16x6xf32>
    %65 = vector.extract_strided_slice %1 {offsets = [2, 1], sizes = [1, 6], strides = [1, 1]} : vector<4x8xf32> to vector<1x6xf32>
    %66 = vector.broadcast %7 : vector<16x1xf32> to vector<16x6xf32>
    %67 = vector.broadcast %65 : vector<1x6xf32> to vector<16x6xf32>
    %68 = arith.mulf %66, %67 : vector<16x6xf32>
    %69 = arith.addf %64, %68 : vector<16x6xf32>
    %70 = vector.extract_strided_slice %1 {offsets = [3, 1], sizes = [1, 6], strides = [1, 1]} : vector<4x8xf32> to vector<1x6xf32>
    %71 = vector.broadcast %8 : vector<16x1xf32> to vector<16x6xf32>
    %72 = vector.broadcast %70 : vector<1x6xf32> to vector<16x6xf32>
    %73 = arith.mulf %71, %72 : vector<16x6xf32>
    %74 = arith.addf %69, %73 : vector<16x6xf32>
    %75 = vector.extract_strided_slice %1 {offsets = [0, 2], sizes = [1, 6], strides = [1, 1]} : vector<4x8xf32> to vector<1x6xf32>
    %76 = vector.broadcast %9 : vector<16x1xf32> to vector<16x6xf32>
    %77 = vector.broadcast %75 : vector<1x6xf32> to vector<16x6xf32>
    %78 = arith.mulf %76, %77 : vector<16x6xf32>
    %79 = arith.addf %74, %78 : vector<16x6xf32>
    %80 = vector.extract_strided_slice %1 {offsets = [1, 2], sizes = [1, 6], strides = [1, 1]} : vector<4x8xf32> to vector<1x6xf32>
    %81 = vector.broadcast %10 : vector<16x1xf32> to vector<16x6xf32>
    %82 = vector.broadcast %80 : vector<1x6xf32> to vector<16x6xf32>
    %83 = arith.mulf %81, %82 : vector<16x6xf32>
    %84 = arith.addf %79, %83 : vector<16x6xf32>
    %cst_7 = arith.constant 0.000000e+00 : f32
    %85 = vector.broadcast %cst_7 : f32 to vector<16x6xf32>
    %86 = arith.maximumf %84, %85 : vector<16x6xf32>
    %c4_i32 = arith.constant 4 : i32
    %87 = arith.muli %arg1, %c4_i32 : i32
    %c1_i32 = arith.constant 1 : i32
    %88 = arith.subi %87, %c1_i32 : i32
    %89 = tpu.iota {dimensions = array<i32: 1>} : vector<1x6xi32>
    %90 = vector.broadcast %88 : i32 to vector<1x6xi32>
    %91 = arith.addi %90, %89 : vector<1x6xi32>
    %c0_i32 = arith.constant 0 : i32
    %92 = vector.broadcast %c0_i32 : i32 to vector<1x6xi32>
    %93 = arith.cmpi sge, %91, %92 : vector<1x6xi32>
    %c2_i32 = arith.constant 2 : i32
    %94 = vector.broadcast %c2_i32 : i32 to vector<1x6xi32>
    %95 = arith.muli %94, %91 : vector<1x6xi32>
    %c8_i32 = arith.constant 8 : i32
    %96 = vector.broadcast %c8_i32 : i32 to vector<1x6xi32>
    %97 = arith.cmpi slt, %95, %96 : vector<1x6xi32>
    %98 = arith.andi %93, %97 : vector<1x6xi1>
    %cst_8 = arith.constant 0.000000e+00 : f32
    %99 = vector.shape_cast %98 : vector<1x6xi1> to vector<1x6xi1>
    %100 = vector.broadcast %99 : vector<1x6xi1> to vector<16x6xi1>
    %101 = vector.broadcast %cst_8 : f32 to vector<16x6xf32>
    %102 = arith.select %100, %48, %101 : vector<16x6xi1>, vector<16x6xf32>
    %c0_i32_9 = arith.constant 0 : i32
    %103 = vector.broadcast %c0_i32_9 : i32 to vector<1x6xi32>
    %104 = arith.cmpi sge, %91, %103 : vector<1x6xi32>
    %c2_i32_10 = arith.constant 2 : i32
    %105 = vector.broadcast %c2_i32_10 : i32 to vector<1x6xi32>
    %106 = arith.muli %105, %91 : vector<1x6xi32>
    %c1_i32_11 = arith.constant 1 : i32
    %107 = vector.broadcast %c1_i32_11 : i32 to vector<1x6xi32>
    %108 = arith.addi %106, %107 : vector<1x6xi32>
    %c8_i32_12 = arith.constant 8 : i32
    %109 = vector.broadcast %c8_i32_12 : i32 to vector<1x6xi32>
    %110 = arith.cmpi slt, %108, %109 : vector<1x6xi32>
    %111 = arith.andi %104, %110 : vector<1x6xi1>
    %cst_13 = arith.constant 0.000000e+00 : f32
    %112 = vector.shape_cast %111 : vector<1x6xi1> to vector<1x6xi1>
    %113 = vector.broadcast %112 : vector<1x6xi1> to vector<16x6xi1>
    %114 = vector.broadcast %cst_13 : f32 to vector<16x6xf32>
    %115 = arith.select %113, %86, %114 : vector<16x6xi1>, vector<16x6xf32>
    %116 = vector.extract_strided_slice %102 {offsets = [0, 0], sizes = [16, 4], strides = [1, 1]} : vector<16x6xf32> to vector<16x4xf32>
    %117 = vector.extract_strided_slice %115 {offsets = [0, 0], sizes = [16, 4], strides = [1, 1]} : vector<16x6xf32> to vector<16x4xf32>
    %118 = vector.extract_strided_slice %102 {offsets = [0, 1], sizes = [16, 4], strides = [1, 1]} : vector<16x6xf32> to vector<16x4xf32>
    %119 = vector.extract_strided_slice %115 {offsets = [0, 1], sizes = [16, 4], strides = [1, 1]} : vector<16x6xf32> to vector<16x4xf32>
    %120 = vector.extract_strided_slice %102 {offsets = [0, 2], sizes = [16, 4], strides = [1, 1]} : vector<16x6xf32> to vector<16x4xf32>
    %121 = tpu.concatenate %116, %117, %118, %119, %120 in 0 : vector<16x4xf32>, vector<16x4xf32>, vector<16x4xf32>, vector<16x4xf32>, vector<16x4xf32> -> vector<80x4xf32>
    %c0_14 = arith.constant 0 : index
    %c0_15 = arith.constant 0 : index
    %122 = vector.load %arg5[%c0_14, %c0_15] : memref<32x80xf32, #tpu.memory_space<vmem>>, vector<32x80xf32>
    %cst_16 = arith.constant dense<0.000000e+00> : vector<32x4xf32>
    %123 = tpu.matmul %122, %121, %cst_16 {dimension_numbers = #tpu.dot_dimension_numbers<[1], [0], [0], [1], [0, 0, 1, 1], [], []>} : vector<32x80xf32>, vector<80x4xf32>, vector<32x4xf32> -> vector<32x4xf32>
    %c0_17 = arith.constant 0 : index
    %c0_18 = arith.constant 0 : index
    %124 = vector.load %arg6[%c0_17, %c0_18] : memref<32x1xf32, #tpu.memory_space<vmem>>, vector<32x1xf32>
    %125 = vector.broadcast %124 : vector<32x1xf32> to vector<32x4xf32>
    %126 = arith.addf %123, %125 : vector<32x4xf32>
    %cst_19 = arith.constant 0.000000e+00 : f32
    %127 = vector.broadcast %cst_19 : f32 to vector<32x4xf32>
    %128 = arith.maximumf %126, %127 : vector<32x4xf32>
    %c4_i32_20 = arith.constant 4 : i32
    %129 = arith.muli %arg1, %c4_i32_20 : i32
    %130 = tpu.iota {dimensions = array<i32: 1>} : vector<1x4xi32>
    %131 = vector.broadcast %129 : i32 to vector<1x4xi32>
    %132 = arith.addi %131, %130 : vector<1x4xi32>
    %c4_i32_21 = arith.constant 4 : i32
    %133 = vector.broadcast %c4_i32_21 : i32 to vector<1x4xi32>
    %134 = arith.cmpi slt, %132, %133 : vector<1x4xi32>
    %cst_22 = arith.constant 0.000000e+00 : f32
    %135 = vector.shape_cast %134 : vector<1x4xi1> to vector<1x4xi1>
    %136 = vector.broadcast %135 : vector<1x4xi1> to vector<32x4xi1>
    %137 = vector.broadcast %cst_22 : f32 to vector<32x4xf32>
    %138 = arith.select %136, %128, %137 : vector<32x4xi1>, vector<32x4xf32>
    %cst_23 = arith.constant dense<0.000000e+00> : vector<32xf32>
    %139 = vector.multi_reduction <add>, %138, %cst_23 [1] : vector<32x4xf32> to vector<32xf32>
    %140 = vector.shape_cast %139 : vector<32xf32> to vector<32x1xf32>
    %c0_i32_24 = arith.constant 0 : i32
    %141 = arith.cmpi eq, %arg1, %c0_i32_24 : i32
    %142 = arith.extui %141 : i1 to i32
    %c0_i32_25 = arith.constant 0 : i32
    %143 = arith.cmpi ne, %142, %c0_i32_25 : i32
    scf.if %143 {
      %cst_32 = arith.constant 0.000000e+00 : f32
      %150 = vector.broadcast %cst_32 : f32 to vector<32x1xf32>
      %c0_33 = arith.constant 0 : index
      %c0_34 = arith.constant 0 : index
      %151 = vector.load %arg10[%c0_33, %c0_34] : memref<32x1xf32, #tpu.memory_space<vmem>>, vector<32x1xf32>
      tpu.vector_store %arg10[%c0_33, %c0_34], %150 {strides = array<i32>} : memref<32x1xf32, #tpu.memory_space<vmem>>, vector<32x1xf32>,
    } else {
    }
    %c0_26 = arith.constant 0 : index
    %c0_27 = arith.constant 0 : index
    %144 = vector.load %arg10[%c0_26, %c0_27] : memref<32x1xf32, #tpu.memory_space<vmem>>, vector<32x1xf32>
    %145 = arith.addf %144, %140 : vector<32x1xf32>
    %c0_28 = arith.constant 0 : index
    %c0_29 = arith.constant 0 : index
    %146 = vector.load %arg10[%c0_28, %c0_29] : memref<32x1xf32, #tpu.memory_space<vmem>>, vector<32x1xf32>
    tpu.vector_store %arg10[%c0_28, %c0_29], %145 {strides = array<i32>} : memref<32x1xf32, #tpu.memory_space<vmem>>, vector<32x1xf32>,
    %c0_i32_30 = arith.constant 0 : i32
    %147 = arith.cmpi eq, %arg1, %c0_i32_30 : i32
    %148 = arith.extui %147 : i1 to i32
    %c0_i32_31 = arith.constant 0 : i32
    %149 = arith.cmpi ne, %148, %c0_i32_31 : i32
    scf.if %149 {
      %c0_32 = arith.constant 0 : index
      %c0_33 = arith.constant 0 : index
      %150 = vector.load %arg10[%c0_32, %c0_33] : memref<32x1xf32, #tpu.memory_space<vmem>>, vector<32x1xf32>
      %c0_34 = arith.constant 0 : index
      %c0_35 = arith.constant 0 : index
      %151 = vector.load %arg7[%c0_34, %c0_35] : memref<32x8xf32, #tpu.memory_space<vmem>>, vector<32x8xf32>
      %152 = vector.broadcast %150 : vector<32x1xf32> to vector<32x8xf32>
      %153 = arith.mulf %152, %151 : vector<32x8xf32>
      %cst_36 = arith.constant dense<0.000000e+00> : vector<8xf32>
      %154 = vector.multi_reduction <add>, %153, %cst_36 [0] : vector<32x8xf32> to vector<8xf32>
      %155 = vector.shape_cast %154 : vector<8xf32> to vector<1x8xf32>
      %c0_37 = arith.constant 0 : index
      %c0_38 = arith.constant 0 : index
      %156 = vector.load %arg8[%c0_37, %c0_38] : memref<1x8xf32, #tpu.memory_space<vmem>>, vector<1x8xf32>
      %157 = arith.addf %155, %156 : vector<1x8xf32>
      %c0_39 = arith.constant 0 : index
      %c0_40 = arith.constant 0 : index
      %c0_41 = arith.constant 0 : index
      %158 = vector.load %arg9[%c0_39, %c0_40, %c0_41] : memref<1x1x8xf32, #tpu.memory_space<vmem>>, vector<1x1x8xf32>
      %159 = vector.shape_cast %158 : vector<1x1x8xf32> to vector<1x8xf32>
      %160 = vector.shape_cast %157 : vector<1x8xf32> to vector<1x1x8xf32>
      tpu.vector_store %arg9[%c0_39, %c0_40, %c0_41], %160 {strides = array<i32>} : memref<1x1x8xf32, #tpu.memory_space<vmem>>, vector<1x1x8xf32>,
    } else {
    }
    return
  }
  func.func @transform_0(%arg0: i32, %arg1: i32) -> (i32, i32, i32, i32) {
    %c0_i32 = arith.constant 0 : i32
    %c0_i32_0 = arith.constant 0 : i32
    %c0_i32_1 = arith.constant 0 : i32
    return %arg0, %arg1, %c0_i32, %c0_i32_0 : i32, i32, i32, i32
  }
  func.func @transform_1(%arg0: i32, %arg1: i32) -> (i32, i32) {
    %c0_i32 = arith.constant 0 : i32
    %c0_i32_0 = arith.constant 0 : i32
    %c0_i32_1 = arith.constant 0 : i32
    return %c0_i32, %c0_i32_0 : i32, i32
  }
  func.func @transform_2(%arg0: i32, %arg1: i32) -> (i32, i32) {
    %c0_i32 = arith.constant 0 : i32
    %c0_i32_0 = arith.constant 0 : i32
    %c0_i32_1 = arith.constant 0 : i32
    return %c0_i32, %c0_i32_0 : i32, i32
  }
  func.func @transform_3(%arg0: i32, %arg1: i32) -> (i32, i32) {
    %c0_i32 = arith.constant 0 : i32
    %c0_i32_0 = arith.constant 0 : i32
    %c0_i32_1 = arith.constant 0 : i32
    return %c0_i32, %c0_i32_0 : i32, i32
  }
  func.func @transform_4(%arg0: i32, %arg1: i32) -> (i32, i32) {
    %c0_i32 = arith.constant 0 : i32
    %c0_i32_0 = arith.constant 0 : i32
    %c0_i32_1 = arith.constant 0 : i32
    return %c0_i32, %c0_i32_0 : i32, i32
  }
  func.func @transform_5(%arg0: i32, %arg1: i32) -> (i32, i32) {
    %c0_i32 = arith.constant 0 : i32
    %c0_i32_0 = arith.constant 0 : i32
    %c0_i32_1 = arith.constant 0 : i32
    return %c0_i32, %c0_i32_0 : i32, i32
  }
  func.func @transform_6(%arg0: i32, %arg1: i32) -> (i32, i32) {
    %c0_i32 = arith.constant 0 : i32
    %c0_i32_0 = arith.constant 0 : i32
    %c0_i32_1 = arith.constant 0 : i32
    return %c0_i32, %c0_i32_0 : i32, i32
  }
  func.func @transform_7(%arg0: i32, %arg1: i32) -> (i32, i32, i32) {
    %c0_i32 = arith.constant 0 : i32
    %c0_i32_0 = arith.constant 0 : i32
    %c0_i32_1 = arith.constant 0 : i32
    return %arg0, %c0_i32, %c0_i32_0 : i32, i32, i32
  }
}

</mosaic_0001>

<bundles_post_ra>
// kernel: tpu_custom_call.1
= control target key start
LH: loop header
LB: loop body
LE: loop exit
PB: predicated region body
PF: predicated region fallthrough
CT: control target
= control target key end

     0   :  { %12 = vsyncpa [#allocation4], 0  ;;  %s1407_s0 = inlined_call_operand.vmem [shape: f32[2,1,4,8], index: 0, kind: input, shape index: {}]   ;;  %s1408_s1 = inlined_call_operand.vmem [shape: f32[16,7], index: 1, kind: input, shape index: {}]   ;;  %s1409_s2 = inlined_call_operand.vmem [shape: f32[16,1], index: 2, kind: input, shape index: {}]   ;;  %s1410_s3 = inlined_call_operand.vmem [shape: f32[32,80], index: 3, kind: input, shape index: {}]   ;;  %s1411_s4 = inlined_call_operand.vmem [shape: f32[32,1], index: 4, kind: input, shape index: {}]   ;;  %s1412_s5 = inlined_call_operand.vmem [shape: f32[32,8], index: 5, kind: input, shape index: {}]   ;;  %s1413_s6 = inlined_call_operand.vmem [shape: f32[1,8], index: 6, kind: input, shape index: {}]   ;;  %s1414_s7 = inlined_call_operand.hbm [shape: f32[2,1,8], index: 7, kind: output, shape index: {}]  }
   0x1   :  { %14 = vsyncpa [#allocation4 + $0x1], 0  ;;  %s1187_s24 = smov 0   ;;  %s1189_s25 = smov 0  }
   0x2   :  { %s1191_s26 = smov 0   ;;  %s1193_s27 = smov 0  }
   0x3   :  { %s1195_s28 = smov 0   ;;  %s1197_s29 = smov 0  }
   0x4 LB: > { %s874_s30 = sadd.s32 4294967295, %s1134_s29   ;;  %s875_s8 = sadd.s32 4294967294, %s1134_s29   ;;  %s1134_s29 = sphi %s1197_s29, %s20_s29   ;;  %s1130_s28 = sphi %s1195_s28, %s1421_s28   ;;  %s1126_s27 = sphi %s1193_s27, %s1420_s27   ;;  %s1122_s26 = sphi %s1191_s26, %s1419_s26   ;;  %s1118_s25 = sphi %s1189_s25, %s1418_s25   ;;  %s1114_s24 = sphi %s1187_s24, %s1417_s24  }
   0x5   : > { %s32_s9 = sadd.s32 1, %s1130_s28  ;;  %s193_s10 = sadd.s32 1, %s1122_s26 }
   0x6   : > { %p34_p0 = scmp.ge.s32.totalorder %s32_s9, 2  ;;  %p203_p1 = scmp.ne.s32.totalorder %s1122_s26, %s1118_s25 }
   0x7   : > { %p204_p2 = scmp.eq.s32.totalorder %s874_s30, 1  ;;  %p209_p3 = scmp.ne.s32.totalorder %s1118_s25, %s1114_s24 }
   0x8   : > { %s1423_s9 = smov (%p34_p0, %s32_s9), 0  ;;  %p210_p5 = scmp.eq.s32.totalorder %s875_s8, 1 }
   0x9   : > { %p1227_p4 = por %p204_p2, %p203_p1  ;;  %s190_s12 = ssub.s32 %s1130_s28, %s1423_s9 }
   0xa   : > { %p878_p6 = scmp.ge.s32.totalorder %s1134_s29, 1  ;;  %p191_p7 = scmp.eq.s32.totalorder %s190_s12, 0 }
   0xb   : > { %p1234_p8 = por %p210_p5, %p209_p3  ;;  %p256_p9 = scmp.lt.s32.totalorder %s1134_s29, 3 }
   0xc   : > { %s1240_s14 = scalar_select %p191_p7, %s1122_s26, %s193_s10  }
   0xd   : > { %p257_p10 = pnand %p878_p6, %p256_p9 }
   0xe   : > { %v297_v0 = vld [vmem:[%s1408_s1] sm:$0xff] (!%p257_p10)  ;;  %v1136_v1 = vmov (!%p257_p10), 3   ;;  %v1137_v2 = vmov (!%p257_p10), 1   ;;  %v298_v3 = vld [vmem:[%s1408_s1 + $0x8] sm:$0xff] (!%p257_p10)  ;;  %v1138_v4 = vmov (!%p257_p10), 2   ;;  %v1139_v5 = vmov (!%p257_p10), 4  }
   0xf   : > { %260 = sbr.rel (%p257_p10) target bundleno = 975 (0x3cf), region = 48  ;;  %1031 = vset.pattern.permute.xlu1 (!%p257_p10), %v1136_v1  ;;  %1030 = vset.pattern.permute.xlu0 (!%p257_p10), %v1137_v2  ;;  %v1140_v6 = vmov (!%p257_p10), 5   ;;  %v1141_v7 = vmov (!%p257_p10), 6   ;;  %v1142_v8 = vmov (!%p257_p10), 0   ;;  %v299_v9 = vld [vmem:[%s1409_s2] sm:$0xff] (!%p257_p10)  ;;  %v300_v10 = vld [vmem:[%s1409_s2 + $0x8] sm:$0xff] (!%p257_p10)  ;;  %v311_v11 = vlaneseq (!%p257_p10) }
  0x10   : > { %362 = vperm.xlu1 (!%p257_p10), %1031, %v297_v0   ;;  %330 = vperm.xlu0 (!%p257_p10), %1030, %v297_v0   ;;  %p289_p11 = scmp.lt.s32.totalorder (!%p257_p10), %s1126_s27, 1  ;;  %s1143_s15 = smov (!%p257_p10), 127   ;;  %vm596_vm7 = vcmask (!%p257_p10), 654336   ;;  %vm724_vm8 = vcmask (!%p257_p10), 7168   ;;  %vm707_vm10 = vcmask (!%p257_p10), 31744   ;;  %vm777_vm11 = vcmask (!%p257_p10), 64512  }
  0x11   : > { %v312_v12 = vshrl.u32 (!%p257_p10), %v311_v11, 7  ;;  %s1144_s16 = smov (!%p257_p10), 126   ;;  %s888_s18 = sshll.u32 (!%p257_p10), %s1126_s27, 4  ;;  %vm793_vm12 = vcmask (!%p257_p10), 57344  }
  0x13   : > { %v339_v13 = vsub.s32 (!%p257_p10), 2, %v312_v12  ;;  %v371_v14 = vsub.s32 (!%p257_p10), 0, %v312_v12  ;;  %v355_v22 = vsub.s32 (!%p257_p10), 3, %v312_v12  ;;  %v313_v29 = vsub.s32 (!%p257_p10), 1, %v312_v12 }
  0x14   : > { %366 = vperm.xlu1 (!%p257_p10), %1031, %v298_v3   ;;  %334 = vperm.xlu0 (!%p257_p10), %1030, %v298_v3  }
  0x16   : > { %s290_s23 = scalar_select %p289_p11, %s1126_s27, 1 }
  0x17   : > { %s1146_s27 = smov [#allocation3]  }
  0x18   : > { %1033 = vset.pattern.permute.xlu1 %v1138_v4  ;;  %1032 = vset.pattern.permute.xlu0 %v1138_v4  ;;  %s879_s30 = sshll.u32 %s290_s23, 2  ;;  %s1360_s23 = scalar_lea.hbm %s1414_s7, %s888_s18 }
  0x19   : > { %350 = vperm.xlu1 %1033, %v298_v3   ;;  %346 = vperm.xlu0 %1032, %v297_v0   ;;  %s295_s12 = scalar_lea.vmem %s1407_s0, %s879_s30  ;;  %s1060_s10 = sshll.u32 %s1146_s27, 4  ;;  %s1061_s10 = int_to_ptr.vmem [resolvable:$false] %s1060_s10 }
  0x1a   : > { %v296_v15 = vld [vmem:[%s295_s12] sm:$0xf]  ;;  %s1062_s12 = scalar_lea.vmem %s1061_s10, 32 }
  0x1b   : > { %v340_v16 = vrot.slane %v296_v15, %v339_v13  ;;  %v372_v17 = vrot.slane %v296_v15, %v371_v14  ;;  %v1261_v28 = vrot.slane %v296_v15, %v355_v22  ;;  %v314_v35 = vrot.slane %v296_v15, %v313_v29 }
  0x1c   : > { %v1289_v13 = vand.u32 127, %v311_v11 }
  0x1d   : > { %1034 = vset.pattern.permute.xlu1 %v1139_v5  ;;  %1035 = vset.pattern.permute.xlu0 %v1139_v5 }
  0x1e   : > { %386 = vperm.xlu1 %1034, %v297_v0   ;;  %390 = vperm.xlu0 %1035, %v298_v3   ;;  %vm700_vm9 = vcmp.lt.s32.totalorder %v1289_v13, 4 }
  0x22   : > { %1036 = vset.pattern.permute.xlu1 %v1140_v6  ;;  %1037 = vset.pattern.permute.xlu0 %v1141_v7 }
  0x23   : > { %406 = vperm.xlu1 %1036, %v297_v0   ;;  %426 = vperm.xlu0 %1037, %v297_v0  }
  0x27   : > { %410 = vperm.xlu1 %1036, %v298_v3   ;;  %1040 = vset.pattern.permute.xlu0 %v1142_v8 }
  0x28   : > { %308 = vperm.xlu0 %1040, %v298_v3  }
  0x2b   : > { %1038 = vset.pattern.permute.xlu1 %v1141_v7 }
  0x2c   : > { %430 = vperm.xlu1 %1038, %v298_v3  }
  0x30   : > { %1039 = vset.pattern.permute.xlu1 %v1142_v8 }
  0x31   : > { %303 = vperm.xlu1 %1039, %v297_v0  }
  0x35   : > { %319 = vperm.xlu1 %1039, %v299_v9  }
  0x39   : > { %324 = vperm.xlu1 %1039, %v300_v10  }
  0x8f   : > { %v363_v18 = vpop.permute.xlu1 %362  ;;  %v331_v19 = vpop.permute.xlu0 %330 }
  0x90   : > { %v373_v20 = vmul.f32 %v372_v17, %v363_v18  ;;  %v341_v21 = vmul.f32 %v340_v16, %v331_v19  ;;  %v451_v25 = vmul.f32 %v372_v17, %v331_v19  ;;  %v475_v47 = vmul.f32 %v363_v18, %v340_v16 }
  0x92   : > { %377 = vrot.lane.b32.xlu0 %v373_v20, %s1143_s15 }
  0x93   : > { %v367_v23 = vpop.permute.xlu1 %366  ;;  %v335_v24 = vpop.permute.xlu0 %334 }
  0x94   : > { %v374_v26 = vmul.f32 %v372_v17, %v367_v23  ;;  %v342_v27 = vmul.f32 %v340_v16, %v335_v24  ;;  %v452_v30 = vmul.f32 %v372_v17, %v335_v24  ;;  %v476_v48 = vmul.f32 %v367_v23, %v340_v16 }
  0x96   : > { %379 = vrot.lane.b32.xlu1 %v374_v26, %s1143_s15  ;;  %455 = vrot.lane.b32.xlu0 %v451_v25, %s1143_s15 }
  0x98   : > { %v351_v31 = vpop.permute.xlu1 %350  ;;  %v347_v32 = vpop.permute.xlu0 %346 }
  0x99   : > { %v358_v33 = vmul.f32 %v1261_v28, %v351_v31  ;;  %v357_v34 = vmul.f32 %v1261_v28, %v347_v32  ;;  %v464_v40 = vmul.f32 %v351_v31, %v314_v35  ;;  %v463_v41 = vmul.f32 %v347_v32, %v314_v35 }
  0x9a   : > { %457 = vrot.lane.b32.xlu1 %v452_v30, %s1143_s15 }
  0x9d   : > { %v387_v36 = vpop.permute.xlu1 %386  ;;  %v391_v37 = vpop.permute.xlu0 %390 }
  0x9e   : > { %v393_v38 = vmul.f32 %v387_v36, %v314_v35  ;;  %v394_v39 = vmul.f32 %v391_v37, %v314_v35  ;;  %v487_v54 = vmul.f32 %v387_v36, %v1261_v28  ;;  %v488_v56 = vmul.f32 %v391_v37, %v1261_v28 }
  0xa0   : > { %399 = vrot.lane.b32.xlu1 %v394_v39, %s1143_s15  ;;  %397 = vrot.lane.b32.xlu0 %v393_v38, %s1143_s15 }
  0xa2   : > { %v407_v42 = vpop.permute.xlu1 %406  ;;  %v427_v46 = vpop.permute.xlu0 %426 }
  0xa3   : > { %v413_v43 = vmul.f32 %v407_v42, %v340_v16  ;;  %v433_v50 = vmul.f32 %v427_v46, %v1261_v28  ;;  %v499_v60 = vmul.f32 %v407_v42, %v372_v17  ;;  %v511_v2 = vmul.f32 %v427_v46, %v314_v35 }
  0xa4   : > { %469 = vrot.lane.b32.xlu1 %v464_v40, %s1143_s15  ;;  %467 = vrot.lane.b32.xlu0 %v463_v41, %s1143_s15 }
  0xa6   : > { %v411_v44 = vpop.permute.xlu1 %410 }
  0xa7   : > { %v414_v45 = vmul.f32 %v411_v44, %v340_v16  ;;  %v309_v55 = vpop.permute.xlu0 %308  ;;  %v500_v61 = vmul.f32 %v411_v44, %v372_v17  ;;  %v530_v16 = vadd.s32 4294967295, %v1289_v13 }
  0xa8   : > { %417 = vrot.lane.b32.xlu0 %v413_v43, %s1143_s15  ;;  %v316_v59 = vmul.f32 %v314_v35, %v309_v55  ;;  %v448_v26 = vmul.f32 %v1261_v28, %v309_v55 }
  0xa9   : > { %419 = vrot.lane.b32.xlu1 %v414_v45, %s1143_s15  ;;  %v532_v20 = vmul.u32 2, %v530_v16  ;;  %vm531_vm0 = vcmp.ge.s32.totalorder %v530_v16, 0 }
  0xab   : > { %v431_v49 = vpop.permute.xlu1 %430  ;;  %vm533_vm1 = vcmp.lt.s32.totalorder %v532_v20, 8 }
  0xac   : > { %479 = vrot.lane.b32.xlu0 %v475_v47, %s1143_s15  ;;  %v434_v51 = vmul.f32 %v431_v49, %v1261_v28  ;;  %v512_v3 = vmul.f32 %v431_v49, %v314_v35  ;;  %vm534_vm2 = vmand %vm531_vm0, %vm533_vm1 }
  0xad   : > { %481 = vrot.lane.b32.xlu1 %v476_v48, %s1143_s15  ;;  %vm932_vm3 = vmpackc.low %vm534_vm2, %vm534_vm2  ;;  %v539_v48 = vadd.s32 1, %v532_v20 }
  0xaf   : > { %vm540_vm4 = vcmp.lt.s32.totalorder %v539_v48, 8 }
  0xb0   : > { %v304_v52 = vpop.permute.xlu1 %303  ;;  %437 = vrot.lane.b32.xlu0 %v433_v50, %s1143_s15  ;;  %vm541_vm5 = vmand %vm531_vm0, %vm540_vm4 }
  0xb1   : > { %v315_v53 = vmul.f32 %v314_v35, %v304_v52  ;;  %439 = vrot.lane.b32.xlu1 %v434_v51, %s1143_s15  ;;  %v447_v23 = vmul.f32 %v1261_v28, %v304_v52  ;;  %vm938_vm6 = vmpackc.low %vm541_vm5, %vm541_vm5 }
  0xb4   : > { %v320_v57 = vpop.permute.xlu1 %319  ;;  %491 = vrot.lane.b32.xlu0 %v487_v54, %s1143_s15 }
  0xb5   : > { %v327_v58 = vadd.f32 %v320_v57, %v315_v53  ;;  %493 = vrot.lane.b32.xlu1 %v488_v56, %s1143_s15  ;;  %v449_v31 = vadd.f32 %v447_v23, %v320_v57  ;;  %v571_v23 = vld [vmem:[%s1410_s3 + $0x18] sm:$0xff] }
  0xb7   : > { %v343_v62 = vadd.f32 %v341_v21, %v327_v58 }
  0xb8   : > { %v325_v63 = vpop.permute.xlu1 %324  ;;  %503 = vrot.lane.b32.xlu0 %v499_v60, %s1144_s16 }
  0xb9   : > { %v328_v0 = vadd.f32 %v325_v63, %v316_v59  ;;  %505 = vrot.lane.b32.xlu1 %v500_v61, %s1144_s16  ;;  %v359_v1 = vadd.f32 %v357_v34, %v343_v62  ;;  %v450_v34 = vadd.f32 %v448_v26, %v325_v63  ;;  %v573_v61 = vld [vmem:[%s1411_s4 + $0x8] sm:$0xff] }
  0xbb   : > { %v344_v4 = vadd.f32 %v342_v27, %v328_v0  ;;  %v568_v0 = vld [vmem:[%s1410_s3] sm:$0xff] }
  0xbc   : > { %515 = vrot.lane.b32.xlu0 %v511_v2, %s1144_s16  ;;  %925 = vmatprep.mubr.msk.f32.mxu0 %vm596_vm7, %v568_v0  ;;  %v749_v0 = vld [vmem:[%s1412_s5] sm:$0xff] }
  0xbd   : > { %517 = vrot.lane.b32.xlu1 %v512_v3, %s1144_s16  ;;  %v360_v5 = vadd.f32 %v358_v33, %v344_v4 }
 0x104   : > { %v378_v6 = vpop.permute.xlu0 %377 }
 0x105   : > { %v383_v19 = vadd.f32 %v378_v6, %v359_v1  ;;  %v570_v1 = vld [vmem:[%s1410_s3 + $0x10] sm:$0xff]  ;;  %v572_v6 = vld [vmem:[%s1411_s4] sm:$0xff] }
 0x106   : > { %928 = vmatprep.mubr.msk.f32.mxu1 %vm596_vm7, %v570_v1 }
 0x108   : > { %v380_v7 = vpop.permute.xlu1 %379  ;;  %v456_v8 = vpop.permute.xlu0 %455 }
 0x109   : > { %v384_v21 = vadd.f32 %v380_v7, %v360_v5  ;;  %v461_v36 = vadd.f32 %v456_v8, %v449_v31  ;;  %v575_v5 = vld [vmem:[%s1411_s4 + $0x18] sm:$0xff]  ;;  %v574_v7 = vld [vmem:[%s1411_s4 + $0x10] sm:$0xff] }
 0x10c   : > { %v458_v9 = vpop.permute.xlu1 %457 }
 0x10d   : > { %v462_v38 = vadd.f32 %v458_v9, %v450_v34 }
 0x112   : > { %v400_v10 = vpop.permute.xlu1 %399  ;;  %v398_v12 = vpop.permute.xlu0 %397 }
 0x113   : > { %v403_v24 = vadd.f32 %v398_v12, %v383_v19  ;;  %v404_v27 = vadd.f32 %v400_v10, %v384_v21 }
 0x116   : > { %v470_v14 = vpop.permute.xlu1 %469  ;;  %v468_v15 = vpop.permute.xlu0 %467 }
 0x117   : > { %v473_v41 = vadd.f32 %v468_v15, %v461_v36  ;;  %v474_v43 = vadd.f32 %v470_v14, %v462_v38 }
 0x11a   : > { %v418_v17 = vpop.permute.xlu0 %417 }
 0x11b   : > { %v420_v18 = vpop.permute.xlu1 %419  ;;  %v423_v29 = vadd.f32 %v418_v17, %v403_v24  ;;  %v1145_v24 = vmov 0.0  }
 0x11c   : > { %v424_v11 = vadd.f32 %v420_v18, %v404_v27  ;;  %726 = vst.msk [vmem:[#allocation2 + $0x8] sm:$0xff] %vm724_vm8, %v1145_v24  ;;  %725 = vst.msk [vmem:[#allocation2] sm:$0xff] %vm724_vm8, %v1145_v24 }
 0x11d   : > { %727 = vst.msk [vmem:[#allocation2 + $0x10] sm:$0xff] %vm724_vm8, %v1145_v24  ;;  %728 = vst.msk [vmem:[#allocation2 + $0x18] sm:$0xff] %vm724_vm8, %v1145_v24 }
 0x11e   : > { %v480_v22 = vpop.permute.xlu0 %479 }
 0x11f   : > { %v482_v25 = vpop.permute.xlu1 %481  ;;  %v485_v46 = vadd.f32 %v480_v22, %v473_v41  ;;  %v569_v22 = vld [vmem:[%s1410_s3 + $0x8] sm:$0xff] }
 0x120   : > { %v486_v49 = vadd.f32 %v482_v25, %v474_v43 }
 0x122   : > { %v438_v30 = vpop.permute.xlu0 %437 }
 0x123   : > { %v443_v32 = vadd.f32 %v438_v30, %v423_v29  ;;  %v440_v33 = vpop.permute.xlu1 %439  ;;  %v730_v48 = vld [vmem:[#allocation2 + $0x8] sm:$0xff] }
 0x124   : > { %v444_v35 = vadd.f32 %v440_v33, %v424_v11 }
 0x125   : > { %v445_v37 = vmax.f32 %v443_v32, 0.0 }
 0x126   : > { %v446_v39 = vmax.f32 %v444_v35, 0.0  ;;  %v492_v40 = vpop.permute.xlu0 %491 }
 0x127   : > { %v537_v28 = vsel %vm534_vm2, %v445_v37, 0.0  ;;  %v494_v42 = vpop.permute.xlu1 %493  ;;  %v497_v51 = vadd.f32 %v492_v40, %v485_v46 }
 0x128   : > { %v538_v44 = vsel %vm534_vm2, %v446_v39, 0.0  ;;  %v931_v45 = vpack.c.bf16 %v446_v39, %v445_v37  ;;  %v498_v53 = vadd.f32 %v494_v42, %v486_v49  ;;  %v729_v49 = vld [vmem:[#allocation2] sm:$0xff] }
 0x129   : > { %v1041_v47 = vpack.i.bf16 %v538_v44, %v537_v28 }
 0x12a   : > { %v504_v50 = vpop.permute.xlu0 %503  ;;  %933 = vmatprep.subr.msk.bf16.mxu0 %vm932_vm3, %v931_v45  ;;  %955 = vmatprep.subr.msk.bf16.mxu1 %vm932_vm3, %v931_v45 }
 0x12b   : > { %v506_v52 = vpop.permute.xlu1 %505  ;;  %936 = vmatpush3.bf16.msk.msra.mxu0 %vm932_vm3, %v931_v45  ;;  %960 = vmatpush3.bf16.msk.msra.mxu1 %vm932_vm3, %v931_v45  ;;  %v509_v54 = vadd.f32 %v504_v50, %v497_v51 }
 0x12c   : > { %1042 = vrot.lane.b32.xlu0 %v1041_v47, %s1143_s15  ;;  %v510_v55 = vadd.f32 %v506_v52, %v498_v53  ;;  %v731_v53 = vld [vmem:[#allocation2 + $0x10] sm:$0xff] }
 0x12e   : > { %v516_v56 = vpop.permute.xlu0 %515 }
 0x12f   : > { %v521_v57 = vadd.f32 %v516_v56, %v509_v54  ;;  %v518_v58 = vpop.permute.xlu1 %517  ;;  %v732_v54 = vld [vmem:[#allocation2 + $0x18] sm:$0xff] }
 0x130   : > { %v522_v59 = vadd.f32 %v518_v58, %v510_v55  ;;  %1052 = vrot.lane.b32.xlu0 %v1041_v47, %s1144_s16  ;;  %s287_s16 = sand.u32 1, %s1118_s25  }
 0x131   : > { %v523_v60 = vmax.f32 %v521_v57, 0.0  ;;  %s288_s19 = scalar_lea.vmem [#allocation3], %s287_s16  ;;  %s796_s30 = scalar_lea.sflag [#allocation4], %s287_s16 }
 0x132   : > { %v524_v62 = vmax.f32 %v522_v59, 0.0  ;;  %s808_s20 = sshll.u32 %s288_s19, 4  ;;  %s1362_s20 = int_to_ptr.vmem [resolvable:$true] %s808_s20 }
 0x133   : > { %v544_v63 = vsel %vm541_vm5, %v523_v60, 0.0  ;;  %s1056_s8 = scalar_lea.vmem %s1362_s20, 16  ;;  %p1063_p1 = scmp.lt.s32.totalorder %s1362_s20, %s1061_s10 }
 0x134   : > { %v545_v2 = vsel %vm541_vm5, %v524_v62, 0.0  ;;  %v937_v3 = vpack.c.bf16 %v524_v62, %v523_v60  ;;  %583 = vperm.xlu0 %1040, %v573_v61   ;;  %p1057_p12 = scmp.ne.s32.totalorder %s1362_s20, %s1056_s8  ;;  %p1064_p2 = scmp.lt.s32.totalorder %s1062_s12, %s1056_s8 }
 0x135   : > { %v1046_v4 = vpack.i.bf16 %v545_v2, %v544_v63  ;;  %v750_v63 = vld [vmem:[%s1412_s5 + $0x8] sm:$0xff] }
 0x136   : > { %939 = vmatprep.subr.msk.bf16.mxu0 %vm938_vm6, %v937_v3  ;;  %956 = vmatprep.subr.msk.bf16.mxu1 %vm938_vm6, %v937_v3  ;;  %p1058_p13 = pnand %p1057_p12, %p1227_p4  ;;  %p1065_p3 = por %p1064_p2, %p1063_p1 }
 0x137   : > { %1047 = vrot.lane.b32.xlu1 %v1046_v4, %s1143_s15  ;;  %942 = vmatpush3.bf16.msk.msra.mxu0 %vm938_vm6, %v937_v3 }
 0x138   : > { %961 = vmatpush3.bf16.msk.msra.mxu1 %vm938_vm6, %v937_v3  ;;  %593 = vperm.xlu0 %1040, %v575_v5   ;;  %v751_v5 = vld [vmem:[%s1412_s5 + $0x10] sm:$0xff]  ;;  %p1059_p0 = pneg %p1058_p13 }
 0x13a   : > { %p1066_p5 = pnand %p1065_p3, %p1059_p0 }
 0x13b   : > { %578 = vperm.xlu1 %1039, %v572_v6  }
 0x13f   : > { %588 = vperm.xlu1 %1039, %v574_v7   ;;  %v752_v7 = vld [vmem:[%s1412_s5 + $0x18] sm:$0xff] }
 0x19e   : > { %v1043_v8 = vpop.permute.xlu0 %1042 }
 0x19f   : > { %v1045_v9 = vunpack.i.h.bf16 %v1043_v8  ;;  %v1044_v10 = vunpack.i.l.bf16 %v1043_v8 }
 0x1a1   : > { %v943_v12 = vpack.c.bf16 %v1045_v9, %v1044_v10 }
 0x1a2   : > { %v1053_v14 = vpop.permute.xlu0 %1052 }
 0x1a3   : > { %944 = vmatprep.subr.bf16.mxu0 %v943_v12  ;;  %957 = vmatprep.subr.bf16.mxu1 %v943_v12  ;;  %v1055_v16 = vunpack.i.h.bf16 %v1053_v14  ;;  %v1054_v17 = vunpack.i.l.bf16 %v1053_v14 }
 0x1a4   : > { %946 = vmatpush3.bf16.msra.mxu0 %v943_v12  ;;  %962 = vmatpush3.bf16.msra.mxu1 %v943_v12 }
 0x1a5   : > { %v951_v21 = vpack.c.bf16 %v1055_v16, %v1054_v17 }
 0x1a9   : > { %v1048_v15 = vpop.permute.xlu1 %1047 }
 0x1aa   : > { %v1050_v18 = vunpack.i.h.bf16 %v1048_v15  ;;  %v1049_v19 = vunpack.i.l.bf16 %v1048_v15 }
 0x1ac   : > { %v947_v20 = vpack.c.bf16 %v1050_v18, %v1049_v19 }
 0x1ae   : > { %948 = vmatprep.subr.bf16.mxu0 %v947_v20  ;;  %958 = vmatprep.subr.bf16.mxu1 %v947_v20 }
 0x1af   : > { %950 = vmatpush3.bf16.msra.mxu0 %v947_v20  ;;  %963 = vmatpush3.bf16.msra.mxu1 %v947_v20 }
 0x1b0   : > { %952 = vmatprep.subr.bf16.mxu0 %v951_v21  ;;  %959 = vmatprep.subr.bf16.mxu1 %v951_v21 }
 0x1b3   : > { %954 = vmatpush3.bf16.msra.mxu0 %v951_v21  ;;  %964 = vmatpush3.bf16.msra.mxu1 %v951_v21  ;;  %v584_v25 = vpop.permute.xlu0 %583 }
 0x1b6   : > { %926 = vmatmul.mubr.msk.f32.vlgmr.msra.gmra.mrb[0].mxu0 %vm596_vm7, %v569_v22  ;;  %929 = vmatmul.mubr.msk.f32.vlgmr.msra.gmra.mrb[0].mxu1 %vm596_vm7, %v571_v23 }
 0x1b7   : > { %v594_v27 = vpop.permute.xlu0 %593 }
 0x1ba   : > { %v579_v26 = vpop.permute.xlu1 %578 }
 0x1be   : > { %v589_v29 = vpop.permute.xlu1 %588 }
 0x289   : > { %v927_v11 = vpop.f32.mrb[0].mxu0  ;;  %v930_v30 = vpop.f32.mrb[0].mxu1 }
 0x28a   : > { %v681_v31 = vadd.f32 %v927_v11, %v584_v25  ;;  %v691_v32 = vadd.f32 %v930_v30, %v594_v27  ;;  %v675_v33 = vpop.f32.mrb[1].mxu0  ;;  %v685_v34 = vpop.f32.mrb[1].mxu1  ;;  %v791_v25 = vld [vmem:[%s1413_s6] sm:$0x1] }
 0x28b   : > { %v676_v35 = vadd.f32 %v675_v33, %v579_v26  ;;  %v686_v36 = vadd.f32 %v685_v34, %v589_v29 }
 0x28c   : > { %v695_v37 = vmax.f32 %v681_v31, 0.0  ;;  %v697_v38 = vmax.f32 %v691_v32, 0.0 }
 0x28d   : > { %v694_v39 = vmax.f32 %v676_v35, 0.0  ;;  %v696_v40 = vmax.f32 %v686_v36, 0.0 }
 0x28e   : > { %v704_v41 = vsel %vm700_vm9, %v695_v37, 0.0  ;;  %v706_v45 = vsel %vm700_vm9, %v697_v38, 0.0 }
 0x28f   : > { %v711_v28 = vsel %vm707_vm10, %v704_v41, 0.0  ;;  %v703_v42 = vsel %vm700_vm9, %v694_v39, 0.0  ;;  %v705_v44 = vsel %vm700_vm9, %v696_v40, 0.0  ;;  %v717_v47 = vsel %vm707_vm10, %v706_v45, 0.0 }
 0x290   : > { %712 = vadd.xlane.f32.xlu0 %v711_v28  ;;  %v708_v43 = vsel %vm707_vm10, %v703_v42, 0.0  ;;  %v714_v46 = vsel %vm707_vm10, %v705_v44, 0.0 }
 0x291   : > { %709 = vadd.xlane.f32.xlu1 %v708_v43 }
 0x294   : > { %715 = vadd.xlane.f32.xlu0 %v714_v46 }
 0x295   : > { %718 = vadd.xlane.f32.xlu1 %v717_v47 }
 0x31d   : > { %v713_v13 = vpop.xlane.xlu0 %712 }
 0x31e   : > { %v734_v50 = vadd.f32 %v730_v48, %v713_v13  ;;  %v710_v51 = vpop.xlane.xlu1 %709 }
 0x31f   : > { %v733_v52 = vadd.f32 %v729_v49, %v710_v51 }
 0x320   : > { %739 = vst.msk [vmem:[#allocation2 + $0x8] sm:$0xff] %vm724_vm8, %v734_v50 }
 0x321   : > { %738 = vst.msk [vmem:[#allocation2] sm:$0xff] %vm724_vm8, %v733_v52  ;;  %v716_v55 = vpop.xlane.xlu0 %715 }
 0x322   : > { %v735_v56 = vadd.f32 %v731_v53, %v716_v55  ;;  %v719_v57 = vpop.xlane.xlu1 %718 }
 0x323   : > { %v736_v58 = vadd.f32 %v732_v54, %v719_v57 }
 0x324   : > { %740 = vst.msk [vmem:[#allocation2 + $0x10] sm:$0xff] %vm724_vm8, %v735_v56 }
 0x325   : > { %741 = vst.msk [vmem:[#allocation2 + $0x18] sm:$0xff] %vm724_vm8, %v736_v58 }
 0x327   : > { %v746_v59 = vld [vmem:[#allocation2 + $0x8] sm:$0xff] }
 0x328   : > { %760 = vperm.xlu1 %1039, %v746_v59   ;;  %v745_v60 = vld [vmem:[#allocation2] sm:$0xff] }
 0x329   : > { %755 = vperm.xlu0 %1040, %v745_v60  }
 0x32b   : > { %v747_v61 = vld [vmem:[#allocation2 + $0x10] sm:$0xff] }
 0x32c   : > { %765 = vperm.xlu1 %1039, %v747_v61   ;;  %v748_v62 = vld [vmem:[#allocation2 + $0x18] sm:$0xff] }
 0x32d   : > { %770 = vperm.xlu0 %1040, %v748_v62  }
 0x3a7   : > { %v761_v1 = vpop.permute.xlu1 %760 }
 0x3a8   : > { %v774_v2 = vmul.f32 %v761_v1, %v750_v63  ;;  %v756_v3 = vpop.permute.xlu0 %755 }
 0x3a9   : > { %v773_v4 = vmul.f32 %v756_v3, %v749_v0 }
 0x3aa   : > { %v779_v6 = vsel %vm777_vm11, %v774_v2, 0.0 }
 0x3ab   : > { %v778_v8 = vsel %vm777_vm11, %v773_v4, 0.0  ;;  %v766_v9 = vpop.permute.xlu1 %765 }
 0x3ac   : > { %v780_v10 = vadd.f32 %v779_v6, %v778_v8  ;;  %v775_v12 = vmul.f32 %v766_v9, %v751_v5  ;;  %v771_v14 = vpop.permute.xlu0 %770 }
 0x3ad   : > { %v776_v15 = vmul.f32 %v771_v14, %v752_v7 }
 0x3ae   : > { %v781_v16 = vsel %vm777_vm11, %v775_v12, 0.0 }
 0x3af   : > { %v782_v17 = vadd.f32 %v781_v16, %v780_v10  ;;  %v783_v18 = vsel %vm777_vm11, %v776_v15, 0.0 }
 0x3b1   : > { %v784_v19 = vadd.f32 %v783_v18, %v782_v17 }
 0x3b3   : > { %v785_v20 = vrot.slane %v784_v19, 4 }
 0x3b5   : > { %v786_v21 = vadd.f32 %v785_v20, %v784_v19 }
 0x3b7   : > { %v787_v22 = vrot.slane %v786_v21, 2 }
 0x3b9   : > { %v788_v23 = vadd.f32 %v787_v22, %v786_v21 }
 0x3bb   : > { %v789_v24 = vrot.slane %v788_v23, 1 }
 0x3bd   : > { %v790_v26 = vadd.f32 %v789_v24, %v788_v23 }
 0x3bf   : > { %v792_v27 = vadd.f32 %v791_v25, %v790_v26 }
 0x3c1   : > { %794 = vst.msk [vmem:[%s288_s19] sm:$0x1] %vm793_vm12, %v792_v27 }
 0x3c2   : > { %1069 = shalt.err (!%p1066_p5)
}
 0x3c3   : > { %s1070_s16 = scalar_lea.hbm %s1360_s23, 16  ;;  %s1074_s18 = scalar_lea.hbm %s1414_s7, 32 }
 0x3c4   : > { %p1071_p6 = scmp.ne.s32.totalorder %s1360_s23, %s1070_s16  ;;  %p1075_p10 = scmp.lt.u32.totalorder %s1360_s23, %s1414_s7 }
 0x3c5   : > { %p1076_p11 = scmp.lt.u32.totalorder %s1074_s18, %s1070_s16  ;;  %p1078_p13 = scmp.lt.u32.totalorder %s1070_s16, %s1360_s23 }
 0x3c6   : > { %p1072_p7 = pnand %p1071_p6, %p1227_p4 }
 0x3c7   : > { %p1077_p12 = por %p1076_p11, %p1075_p10 }
 0x3c8   : > { %p1073_p9 = pneg %p1072_p7 }
 0x3c9   : > { %p1079_p0 = por %p1078_p13, %p1077_p12 }
 0x3cb   : > { %p1080_p1 = pnand %p1079_p0, %p1073_p9 }
 0x3cd   : > { %1083 = shalt.err (!%p1080_p1)
}
 0x3ce   : > { %965 = dma.vmem_to_hbm [thread:$0]  (%p1227_p4), %s1362_s20, 16, %s1360_s23, %s796_s30  }
 0x3cf PF: > { %p971_p2 = scmp.ge.s32.totalorder %s1134_s29, 2  ;;  %s820_s22 = sand.u32 1, %s1114_s24  }
 0x3d0   : > { %s821_s8 = scalar_lea.sflag [#allocation4], %s820_s22 }
 0x3d1   : > { %p968_p3 = pnand %p971_p2, %p1234_p8 }
 0x3d3   : > { %1109 = dma.done.wait (!%p968_p3), %s821_s8, 16  }
 0x3d4   : > { %1111 = vsyncadd (!%p968_p3), %s821_s8, 4294967280  ;;  %s20_s29 = sadd.s32 1, %s1134_s29   ;;  %s1417_s24 = smov %s1118_s25 }
 0x3d5   : > { %p17_p5 = scmp.ge.s32.totalorder %s20_s29, 4   ;;  %s1418_s25 = smov %s1122_s26 }
 0x3d6   : > { %s1419_s26 = smov %s1240_s14  ;;  %s1420_s27 = smov %s1130_s28 }
 0x3d7   : > { %s1421_s28 = smov %s1423_s9  ;;  %19 = sbr.rel (!%p17_p5) target bundleno = 4 (0x4), region = 91 }
 0x3de   :  { %825 = vsyncpa [#allocation4], 1 }
 0x3df   :  { %827 = vsyncpa [#allocation4 + $0x1], 1 }

</bundles_post_ra>
